<compile_context>
chip_gen: v5e
topology: v5e:2x2
jax: 0.10.0
libtpu: 0.0.40
codegen_flags: <defaults>
</compile_context>

<pallas_src>
import jax
import jax.numpy as jnp
from jax.experimental import pallas as pl
from jax.experimental.pallas import tpu as pltpu

LANE = 128  # vreg lane width


def _round_up(x, m):
    return (x + m - 1) // m * m


def _mlp_kernel(x_ref, w1_ref, b1_ref, w2_ref, b2_ref, o_ref):
    # Cast x to the matmul dtype INSIDE the kernel (hidden under DMA for a
    # memory-bound kernel); no-op for the f32 path.
    x = x_ref[...].astype(w1_ref.dtype)
    # hidden = relu(x @ W1 + b1): MXU matmul with f32 accumulation.
    h = jnp.dot(x, w1_ref[...], preferred_element_type=jnp.float32)
    # Bias-add + ReLU in f32 (VPU-friendly on all generations, incl. v5e).
    h = jnp.maximum(h + b1_ref[...], 0.0)
    # out = hidden @ W2 + b2; cast h to W2's dtype so the bf16 path hits the
    # full MXU rate (no-op for the f32 path).
    y = jnp.dot(h.astype(w2_ref.dtype), w2_ref[...],
                preferred_element_type=jnp.float32)
    o_ref[...] = (y + b2_ref[...]).astype(o_ref.dtype)


def prepare_params(w1, b1, w2, b2, *, compute_dtype=jnp.float32):
    """One-time parameter prep (call once at init, NOT per forward).

    - Transposes PyTorch nn.Linear weights (out,in) -> (in,out).
    - Zero-pads hidden/output dims up to multiples of 128 (lane-dense matmul
      outputs and stores).  Zero padding is exact: padded hidden columns give
      relu(0 + 0) = 0 and contribute nothing to the second matmul; padded
      output columns are sliced away in the wrapper.
    - Casts weights once to `compute_dtype`.  bf16 is recommended on ALL
      generations (v5e/v6e/v7x MXUs are bf16-native; f32 matmul takes multiple
      passes).  Biases stay f32 since bias-add/ReLU run in f32.
    """
    hidden_size, input_size = w1.shape
    output_size = w2.shape[0]
    h_pad = _round_up(hidden_size, LANE)
    o_pad = _round_up(output_size, LANE)

    w1_t = jnp.zeros((input_size, h_pad), compute_dtype)
    w1_t = w1_t.at[:, :hidden_size].set(jnp.asarray(w1, compute_dtype).T)
    w2_t = jnp.zeros((h_pad, o_pad), compute_dtype)
    w2_t = w2_t.at[:hidden_size, :output_size].set(jnp.asarray(w2, compute_dtype).T)
    b1_p = jnp.zeros((1, h_pad), jnp.float32)
    b1_p = b1_p.at[:, :hidden_size].set(jnp.asarray(b1, jnp.float32)[None, :])
    b2_p = jnp.zeros((1, o_pad), jnp.float32)
    b2_p = b2_p.at[:, :output_size].set(jnp.asarray(b2, jnp.float32)[None, :])

    return {
        "w1_t": w1_t, "b1": b1_p, "w2_t": w2_t, "b2": b2_p,
        "output_size": output_size, "compute_dtype": compute_dtype,
    }


def _vmem_budget_bytes():
    """~75% of this generation's per-core VMEM (96 MiB on v5e/v6e, 48 on v7x)."""
    try:
        cap = int(pltpu.get_tpu_info().vmem_capacity_bytes)
    except Exception:
        cap = 64 * 1024 * 1024  # conservative (v7x per-TC) fallback
    return cap * 3 // 4


def red_neuronal_forward(x, params, *, tm=1024):
    """Forward pass. x: (B, input_size) f32 -> (B, output_size) f32."""
    w1_t, b1 = params["w1_t"], params["b1"]
    w2_t, b2 = params["w2_t"], params["b2"]
    output_size = params["output_size"]
    cdt = jnp.dtype(params["compute_dtype"])
    wd = cdt.itemsize

    B, input_size = x.shape
    h_pad = w1_t.shape[1]
    o_pad = w2_t.shape[1]

    budget = _vmem_budget_bytes()

    # Grid-invariant weights/biases: single-buffered (pl.Buffered(1)).
    resident = (input_size * h_pad + h_pad * o_pad) * wd + (h_pad + o_pad) * 4

    # Sublane granule: 8 for f32 blocks; 16 when the matmul operands are bf16
    # (packed two rows per sublane).
    granule = 16 if wd < 4 else 8

    def per_tile(t):
        return (2 * t * input_size * 4       # x tile, f32, double-buffered
                + 2 * t * o_pad * 4          # out tile, f32, double-buffered
                + t * input_size * wd        # in-kernel x cast
                + t * h_pad * 4              # hidden (f32)
                + t * h_pad * wd             # hidden cast to compute dtype
                + t * o_pad * 4)             # y accumulator (f32)

    # Start big (fewer grid steps amortize the ~600-cycle per-step overhead),
    # shrink only if the VMEM budget demands it.
    tm_eff = max(granule, min(_round_up(tm, granule), _round_up(B, granule)))
    while tm_eff > granule and resident + per_tile(tm_eff) > budget:
        tm_eff = max(granule, _round_up(tm_eff // 2, granule))

    num_tiles = pl.cdiv(B, tm_eff)
    vmem_limit = int(min(budget,
                         max(resident + per_tile(tm_eff) + (8 << 20), 16 << 20)))

    # Shard the batch grid across TensorCores only when both get work.
    dim_sem = ("parallel",) if num_tiles >= 2 else ("arbitrary",)

    def call(weight_mode):
        wkw = {} if weight_mode is None else dict(pipeline_mode=weight_mode)
        return pl.pallas_call(
            _mlp_kernel,
            out_shape=jax.ShapeDtypeStruct((B, o_pad), jnp.float32),
            grid=(num_tiles,),
            in_specs=[
                pl.BlockSpec((tm_eff, input_size), lambda i: (i, 0)),        # x
                pl.BlockSpec((input_size, h_pad), lambda i: (0, 0), **wkw),  # W1
                pl.BlockSpec((1, h_pad), lambda i: (0, 0), **wkw),           # b1
                pl.BlockSpec((h_pad, o_pad), lambda i: (0, 0), **wkw),       # W2
                pl.BlockSpec((1, o_pad), lambda i: (0, 0), **wkw),           # b2
            ],
            out_specs=pl.BlockSpec((tm_eff, o_pad), lambda i: (i, 0)),
            compiler_params=pltpu.CompilerParams(
                dimension_semantics=dim_sem,
                vmem_limit_bytes=vmem_limit,
            ),
        )(x, w1_t, b1, w2_t, b2)

    try:
        # Preferred: single-buffer the grid-invariant weight/bias blocks.
        out_padded = call(pl.Buffered(1))
    except Exception:
        # Fallback for JAX versions that reject Buffered(1): default buffering.
        out_padded = call(None)

    # TODO(synk): if hidden_size ever outgrows VMEM-resident weights, add a
    # K-reduction grid axis with an f32 accumulator scratch (pattern P3).
    # TODO(synk): for very large B with tiny output_size, a masked lane store
    # of only the true columns would cut the 128-wide writeback; measure both.
    return out_padded[:B, :output_size]


def _reference(x, w1, b1, w2, b2):
    h = jnp.maximum(x @ w1.T + b1, 0.0)
    return h @ w2.T + b2


if __name__ == "__main__":
    # Small shapes consistent with the module: input=16, hidden=32, output=8.
    input_size, hidden_size, output_size = 16, 32, 8

    key = jax.random.PRNGKey(0)
    kx, kw1, kb1, kw2, kb2, kx2 = jax.random.split(key, 6)

    w1 = jax.random.normal(kw1, (hidden_size, input_size), dtype=jnp.float32) * 0.1
    b1 = jax.random.normal(kb1, (hidden_size,), dtype=jnp.float32) * 0.1
    w2 = jax.random.normal(kw2, (output_size, hidden_size), dtype=jnp.float32) * 0.1
    b2 = jax.random.normal(kb2, (output_size,), dtype=jnp.float32) * 0.1

    # --- Test 1: f32 path, batch=8 (exact vs reference).
    x = jax.random.normal(kx, (8, input_size), dtype=jnp.float32)
    ref = _reference(x, w1, b1, w2, b2)
    params_f32 = prepare_params(w1, b1, w2, b2, compute_dtype=jnp.float32)
    out = jax.block_until_ready(red_neuronal_forward(x, params_f32))
    assert out.shape == (8, output_size)
    assert jnp.allclose(out, ref, atol=1e-5, rtol=1e-5), "f32 mismatch vs reference"

    # --- Test 2: f32 path, batch=13 with tm=8 -> 2 grid steps + masked tail
    # (exercises the no-pad cdiv grid path).
    x13 = jax.random.normal(kx2, (13, input_size), dtype=jnp.float32)
    ref13 = _reference(x13, w1, b1, w2, b2)
    out13 = jax.block_until_ready(red_neuronal_forward(x13, params_f32, tm=8))
    assert out13.shape == (13, output_size)
    assert jnp.allclose(out13, ref13, atol=1e-5, rtol=1e-5), "tail-tile mismatch"

    # --- Test 3: bf16 matmul operands, f32 accumulation (full MXU rate on
    # every generation; x cast happens inside the kernel).
    params_bf16 = prepare_params(w1, b1, w2, b2, compute_dtype=jnp.bfloat16)
    out_bf16 = jax.block_until_ready(red_neuronal_forward(x, params_bf16))
    assert out_bf16.shape == (8, output_size)
    assert jnp.allclose(out_bf16, ref, atol=5e-2, rtol=5e-2), "bf16 mismatch vs reference"

    print("KERNEL_OK")
</pallas_src>

<mosaic_0001>
module attributes {stable_mosaic.version = 11 : i64} {
  func.func @_mlp_kernel(%arg0: i32, %arg1: memref<8x16xf32, #tpu.memory_space<vmem>>, %arg2: memref<16x128xf32, #tpu.memory_space<vmem>>, %arg3: memref<1x128xf32, #tpu.memory_space<vmem>>, %arg4: memref<128x128xf32, #tpu.memory_space<vmem>>, %arg5: memref<1x128xf32, #tpu.memory_space<vmem>>, %arg6: memref<8x128xf32, #tpu.memory_space<vmem>>) attributes {dimension_semantics = [#tpu.dimension_semantics<arbitrary>], iteration_bounds = array<i64: 1>, scalar_prefetch = 0 : i64, scratch_operands = 0 : i64, tpu.core_type = #tpu.core_type<tc>, window_params = [{transform_indices = @transform_0, window_bounds = array<i64: 8, 16>}, {pipeline_mode = #tpu.pipeline_mode<synchronous>, transform_indices = @transform_1, window_bounds = array<i64: 16, 128>}, {pipeline_mode = #tpu.pipeline_mode<synchronous>, transform_indices = @transform_2, window_bounds = array<i64: 1, 128>}, {pipeline_mode = #tpu.pipeline_mode<synchronous>, transform_indices = @transform_3, window_bounds = array<i64: 128, 128>}, {pipeline_mode = #tpu.pipeline_mode<synchronous>, transform_indices = @transform_4, window_bounds = array<i64: 1, 128>}, {transform_indices = @transform_5, window_bounds = array<i64: 8, 128>}]} {
    %c0 = arith.constant 0 : index
    %c0_0 = arith.constant 0 : index
    %0 = vector.load %arg1[%c0, %c0_0] : memref<8x16xf32, #tpu.memory_space<vmem>>, vector<8x16xf32>
    %c0_1 = arith.constant 0 : index
    %c0_2 = arith.constant 0 : index
    %1 = vector.load %arg2[%c0_1, %c0_2] : memref<16x128xf32, #tpu.memory_space<vmem>>, vector<16x128xf32>
    %cst = arith.constant dense<0.000000e+00> : vector<8x128xf32>
    %2 = tpu.matmul %0, %1, %cst {dimension_numbers = #tpu.dot_dimension_numbers<[1], [0], [0], [1], [0, 0, 1, 1], [], []>} : vector<8x16xf32>, vector<16x128xf32>, vector<8x128xf32> -> vector<8x128xf32>
    %c0_3 = arith.constant 0 : index
    %c0_4 = arith.constant 0 : index
    %3 = vector.load %arg3[%c0_3, %c0_4] : memref<1x128xf32, #tpu.memory_space<vmem>>, vector<1x128xf32>
    %4 = vector.broadcast %3 : vector<1x128xf32> to vector<8x128xf32>
    %5 = arith.addf %2, %4 : vector<8x128xf32>
    %cst_5 = arith.constant 0.000000e+00 : f32
    %6 = vector.broadcast %cst_5 : f32 to vector<8x128xf32>
    %7 = arith.maximumf %5, %6 : vector<8x128xf32>
    %c0_6 = arith.constant 0 : index
    %c0_7 = arith.constant 0 : index
    %8 = vector.load %arg4[%c0_6, %c0_7] : memref<128x128xf32, #tpu.memory_space<vmem>>, vector<128x128xf32>
    %cst_8 = arith.constant dense<0.000000e+00> : vector<8x128xf32>
    %9 = tpu.matmul %7, %8, %cst_8 {dimension_numbers = #tpu.dot_dimension_numbers<[1], [0], [0], [1], [0, 0, 1, 1], [], []>} : vector<8x128xf32>, vector<128x128xf32>, vector<8x128xf32> -> vector<8x128xf32>
    %c0_9 = arith.constant 0 : index
    %c0_10 = arith.constant 0 : index
    %10 = vector.load %arg5[%c0_9, %c0_10] : memref<1x128xf32, #tpu.memory_space<vmem>>, vector<1x128xf32>
    %11 = vector.broadcast %10 : vector<1x128xf32> to vector<8x128xf32>
    %12 = arith.addf %9, %11 : vector<8x128xf32>
    %c0_11 = arith.constant 0 : index
    %c0_12 = arith.constant 0 : index
    %13 = vector.load %arg6[%c0_11, %c0_12] : memref<8x128xf32, #tpu.memory_space<vmem>>, vector<8x128xf32>
    tpu.vector_store %arg6[%c0_11, %c0_12], %12 {strides = array<i32>} : memref<8x128xf32, #tpu.memory_space<vmem>>, vector<8x128xf32>,
    return
  }
  func.func @transform_0(%arg0: i32) -> (i32, i32) {
    %c0_i32 = arith.constant 0 : i32
    %c0_i32_0 = arith.constant 0 : i32
    return %arg0, %c0_i32 : i32, i32
  }
  func.func @transform_1(%arg0: i32) -> (i32, i32) {
    %c0_i32 = arith.constant 0 : i32
    %c0_i32_0 = arith.constant 0 : i32
    %c0_i32_1 = arith.constant 0 : i32
    return %c0_i32, %c0_i32_0 : i32, i32
  }
  func.func @transform_2(%arg0: i32) -> (i32, i32) {
    %c0_i32 = arith.constant 0 : i32
    %c0_i32_0 = arith.constant 0 : i32
    %c0_i32_1 = arith.constant 0 : i32
    return %c0_i32, %c0_i32_0 : i32, i32
  }
  func.func @transform_3(%arg0: i32) -> (i32, i32) {
    %c0_i32 = arith.constant 0 : i32
    %c0_i32_0 = arith.constant 0 : i32
    %c0_i32_1 = arith.constant 0 : i32
    return %c0_i32, %c0_i32_0 : i32, i32
  }
  func.func @transform_4(%arg0: i32) -> (i32, i32) {
    %c0_i32 = arith.constant 0 : i32
    %c0_i32_0 = arith.constant 0 : i32
    %c0_i32_1 = arith.constant 0 : i32
    return %c0_i32, %c0_i32_0 : i32, i32
  }
  func.func @transform_5(%arg0: i32) -> (i32, i32) {
    %c0_i32 = arith.constant 0 : i32
    %c0_i32_0 = arith.constant 0 : i32
    return %arg0, %c0_i32 : i32, i32
  }
}

module attributes {stable_mosaic.version = 11 : i64} {
  func.func @_mlp_kernel(%arg0: i32, %arg1: memref<8x16xf32, #tpu.memory_space<vmem>>, %arg2: memref<16x128xf32, #tpu.memory_space<vmem>>, %arg3: memref<1x128xf32, #tpu.memory_space<vmem>>, %arg4: memref<128x128xf32, #tpu.memory_space<vmem>>, %arg5: memref<1x128xf32, #tpu.memory_space<vmem>>, %arg6: memref<8x128xf32, #tpu.memory_space<vmem>>) attributes {dimension_semantics = [#tpu.dimension_semantics<arbitrary>], iteration_bounds = array<i64: 1>, scalar_prefetch = 0 : i64, scratch_operands = 0 : i64, tpu.core_type = #tpu.core_type<tc>, window_params = [{transform_indices = @transform_0, window_bounds = array<i64: 8, 16>}, {pipeline_mode = #tpu.pipeline_mode<synchronous>, transform_indices = @transform_1, window_bounds = array<i64: 16, 128>}, {pipeline_mode = #tpu.pipeline_mode<synchronous>, transform_indices = @transform_2, window_bounds = array<i64: 1, 128>}, {pipeline_mode = #tpu.pipeline_mode<synchronous>, transform_indices = @transform_3, window_bounds = array<i64: 128, 128>}, {pipeline_mode = #tpu.pipeline_mode<synchronous>, transform_indices = @transform_4, window_bounds = array<i64: 1, 128>}, {transform_indices = @transform_5, window_bounds = array<i64: 8, 128>}]} {
    %c0 = arith.constant 0 : index
    %c0_0 = arith.constant 0 : index
    %0 = vector.load %arg1[%c0, %c0_0] : memref<8x16xf32, #tpu.memory_space<vmem>>, vector<8x16xf32>
    %c0_1 = arith.constant 0 : index
    %c0_2 = arith.constant 0 : index
    %1 = vector.load %arg2[%c0_1, %c0_2] : memref<16x128xf32, #tpu.memory_space<vmem>>, vector<16x128xf32>
    %cst = arith.constant dense<0.000000e+00> : vector<8x128xf32>
    %2 = tpu.matmul %0, %1, %cst {dimension_numbers = #tpu.dot_dimension_numbers<[1], [0], [0], [1], [0, 0, 1, 1], [], []>} : vector<8x16xf32>, vector<16x128xf32>, vector<8x128xf32> -> vector<8x128xf32>
    %c0_3 = arith.constant 0 : index
    %c0_4 = arith.constant 0 : index
    %3 = vector.load %arg3[%c0_3, %c0_4] : memref<1x128xf32, #tpu.memory_space<vmem>>, vector<1x128xf32>
    %4 = vector.broadcast %3 : vector<1x128xf32> to vector<8x128xf32>
    %5 = arith.addf %2, %4 : vector<8x128xf32>
    %cst_5 = arith.constant 0.000000e+00 : f32
    %6 = vector.broadcast %cst_5 : f32 to vector<8x128xf32>
    %7 = arith.maximumf %5, %6 : vector<8x128xf32>
    %c0_6 = arith.constant 0 : index
    %c0_7 = arith.constant 0 : index
    %8 = vector.load %arg4[%c0_6, %c0_7] : memref<128x128xf32, #tpu.memory_space<vmem>>, vector<128x128xf32>
    %cst_8 = arith.constant dense<0.000000e+00> : vector<8x128xf32>
    %9 = tpu.matmul %7, %8, %cst_8 {dimension_numbers = #tpu.dot_dimension_numbers<[1], [0], [0], [1], [0, 0, 1, 1], [], []>} : vector<8x128xf32>, vector<128x128xf32>, vector<8x128xf32> -> vector<8x128xf32>
    %c0_9 = arith.constant 0 : index
    %c0_10 = arith.constant 0 : index
    %10 = vector.load %arg5[%c0_9, %c0_10] : memref<1x128xf32, #tpu.memory_space<vmem>>, vector<1x128xf32>
    %11 = vector.broadcast %10 : vector<1x128xf32> to vector<8x128xf32>
    %12 = arith.addf %9, %11 : vector<8x128xf32>
    %c0_11 = arith.constant 0 : index
    %c0_12 = arith.constant 0 : index
    %13 = vector.load %arg6[%c0_11, %c0_12] : memref<8x128xf32, #tpu.memory_space<vmem>>, vector<8x128xf32>
    tpu.vector_store %arg6[%c0_11, %c0_12], %12 {strides = array<i32>} : memref<8x128xf32, #tpu.memory_space<vmem>>, vector<8x128xf32>,
    return
  }
  func.func @transform_0(%arg0: i32) -> (i32, i32) {
    %c0_i32 = arith.constant 0 : i32
    %c0_i32_0 = arith.constant 0 : i32
    return %arg0, %c0_i32 : i32, i32
  }
  func.func @transform_1(%arg0: i32) -> (i32, i32) {
    %c0_i32 = arith.constant 0 : i32
    %c0_i32_0 = arith.constant 0 : i32
    %c0_i32_1 = arith.constant 0 : i32
    return %c0_i32, %c0_i32_0 : i32, i32
  }
  func.func @transform_2(%arg0: i32) -> (i32, i32) {
    %c0_i32 = arith.constant 0 : i32
    %c0_i32_0 = arith.constant 0 : i32
    %c0_i32_1 = arith.constant 0 : i32
    return %c0_i32, %c0_i32_0 : i32, i32
  }
  func.func @transform_3(%arg0: i32) -> (i32, i32) {
    %c0_i32 = arith.constant 0 : i32
    %c0_i32_0 = arith.constant 0 : i32
    %c0_i32_1 = arith.constant 0 : i32
    return %c0_i32, %c0_i32_0 : i32, i32
  }
  func.func @transform_4(%arg0: i32) -> (i32, i32) {
    %c0_i32 = arith.constant 0 : i32
    %c0_i32_0 = arith.constant 0 : i32
    %c0_i32_1 = arith.constant 0 : i32
    return %c0_i32, %c0_i32_0 : i32, i32
  }
  func.func @transform_5(%arg0: i32) -> (i32, i32) {
    %c0_i32 = arith.constant 0 : i32
    %c0_i32_0 = arith.constant 0 : i32
    return %arg0, %c0_i32 : i32, i32
  }
}

</mosaic_0001>

<bundles_post_ra>
// kernel: tpu_custom_call.1
= control target key start
LH: loop header
LB: loop body
LE: loop exit
PB: predicated region body
PF: predicated region fallthrough
CT: control target
= control target key end

     0   :  { %10 = vsyncpa [#allocation3], 0  ;;  %s322_s0 = inlined_call_operand.hbm [shape: f32[8,16], index: 0, kind: input, shape index: {}]   ;;  %s323_s1 = inlined_call_operand.hbm [shape: f32[16,128], index: 1, kind: input, shape index: {}]   ;;  %s324_s2 = inlined_call_operand.vmem [shape: f32[1,128], index: 2, kind: input, shape index: {}]   ;;  %s325_s3 = inlined_call_operand.hbm [shape: f32[128,128], index: 3, kind: input, shape index: {}]   ;;  %s326_s4 = inlined_call_operand.vmem [shape: f32[1,128], index: 4, kind: input, shape index: {}]   ;;  %s327_s5 = inlined_call_operand.hbm [shape: f32[8,128], index: 5, kind: output, shape index: {}]  }
   0x1   :  { %11 = vsyncpa [#allocation6], 0  ;;  %s28_s20 = sshll.u32 %s323_s1, 4  ;;  %s29_s20 = int_to_ptr.hbm [resolvable:$true] %s28_s20 }
   0x2   :  { %12 = vsyncpa [#allocation4], 0  ;;  %s268_s21 = smov [#allocation5]   ;;  %s18_s25 = sshll.u32 %s322_s0, 4  ;;  %s19_s25 = int_to_ptr.hbm [resolvable:$true] %s18_s25 }
   0x3   :  { %s30_s22 = sshll.u32 %s268_s21, 4  ;;  %s269_s26 = smov 128   ;;  %s31_s22 = int_to_ptr.vmem [resolvable:$true] %s30_s22 }
   0x4   :  { %s270_s27 = smov 8   ;;  %s271_s28 = smov [#allocation2]  }
   0x5   :  { %36 = dma.hbm_to_vmem [thread:$0]  %s29_s20, 256, %s31_s22, [#allocation6], %s269_s26, %s269_s26, %s270_s27  }
   0x6   :  { %s20_s29 = sshll.u32 %s271_s28, 4  ;;  %s43_s7 = sshll.u32 %s325_s3, 4  ;;  %s21_s29 = int_to_ptr.vmem [resolvable:$true] %s20_s29  ;;  %s44_s7 = int_to_ptr.hbm [resolvable:$true] %s43_s7 }
   0x7   :  { %23 = dma.hbm_to_vmem [thread:$0]  %s19_s25, 128, %s21_s29, [#allocation3]  }
   0x8   :  { %s272_s1 = smov [#allocation7]  }
   0x9   :  { %s45_s8 = sshll.u32 %s272_s1, 4  ;;  %s46_s8 = int_to_ptr.vmem [resolvable:$true] %s45_s8 }
   0xa   :  { %51 = dma.hbm_to_vmem [thread:$0]  %s44_s7, 2048, %s46_s8, [#allocation6], %s269_s26, %s269_s26, %s270_s27  }
   0xb   :  { %262 = dma.done.wait [#allocation3], 128  }
   0xc   :  { %263 = vsyncadd [#allocation3], 4294967168 }
   0xd   :  { %264 = dma.done.wait [#allocation6], 2304  }
   0xe   :  { %265 = vsyncadd [#allocation6], 4294964992  ;;  %v68_v0 = vld [vmem:[#allocation5 + $0x8] sm:$0xff]  ;;  %v67_v1 = vld [vmem:[#allocation5] sm:$0xff]  ;;  %vm73_vm0 = vcmask 130048   ;;  %s273_s11 = smov [#allocation8]  }
   0xf   :  { %91 = vmatpush.msra.mxu0 %v68_v0  ;;  %v66_v2 = vld [vmem:[#allocation2] sm:$0xff]  ;;  %v113_v3 = vld [vmem:[#allocation7 + $0x78] sm:$0xff]  ;;  %v112_v4 = vld [vmem:[#allocation7 + $0x70] sm:$0xff]  ;;  %s144_s12 = sshll.u32 %s273_s11, 4  ;;  %s146_s15 = sshll.u32 %s327_s5, 4  ;;  %s145_s12 = int_to_ptr.vmem [resolvable:$true] %s144_s12  ;;  %s147_s15 = int_to_ptr.hbm [resolvable:$true] %s146_s15 }
  0x10   :  { %118 = vmatpush.msra.mxu1 %v113_v3  ;;  %v111_v5 = vld [vmem:[#allocation7 + $0x68] sm:$0xff]  ;;  %v110_v6 = vld [vmem:[#allocation7 + $0x60] sm:$0xff]  ;;  %v109_v7 = vld [vmem:[#allocation7 + $0x58] sm:$0xff] }
  0x11   :  { %92 = vmatpush.msra.mxu0 %v67_v1  ;;  %v108_v8 = vld [vmem:[#allocation7 + $0x50] sm:$0xff]  ;;  %v107_v9 = vld [vmem:[#allocation7 + $0x48] sm:$0xff]  ;;  %v106_v10 = vld [vmem:[#allocation7 + $0x40] sm:$0xff] }
  0x12   :  { %157 = vmatmul.msk.f32.vlgmr.msra.gmra.mxu0 %vm73_vm0, %v66_v2  ;;  %119 = vmatpush.msra.mxu1 %v112_v4  ;;  %v105_v11 = vld [vmem:[#allocation7 + $0x38] sm:$0xff]  ;;  %v104_v12 = vld [vmem:[#allocation7 + $0x30] sm:$0xff]  ;;  %v103_v13 = vld [vmem:[#allocation7 + $0x28] sm:$0xff] }
  0x13   :  { %v102_v14 = vld [vmem:[#allocation7 + $0x20] sm:$0xff]  ;;  %v101_v15 = vld [vmem:[#allocation7 + $0x18] sm:$0xff]  ;;  %v100_v16 = vld [vmem:[#allocation7 + $0x10] sm:$0xff] }
  0x14   :  { %120 = vmatpush.msra.mxu1 %v111_v5  ;;  %v99_v17 = vld [vmem:[#allocation7 + $0x8] sm:$0xff]  ;;  %v98_v18 = vld [vmem:[#allocation7] sm:$0xff] }
  0x15   :  { %v164_v19 = vld [vmem:[%s324_s2] ss:$0 sm:$0xff] }
  0x16   :  { %121 = vmatpush.msra.mxu1 %v110_v6  ;;  %v165_v23 = vld [vmem:[%s326_s4] ss:$0 sm:$0xff] }
  0x18   :  { %122 = vmatpush.msra.mxu1 %v109_v7 }
  0x1a   :  { %123 = vmatpush.msra.mxu1 %v108_v8 }
  0x1c   :  { %124 = vmatpush.msra.mxu1 %v107_v9 }
  0x1e   :  { %125 = vmatpush.msra.mxu1 %v106_v10 }
  0x20   :  { %126 = vmatpush.msra.mxu1 %v105_v11 }
  0x22   :  { %127 = vmatpush.msra.mxu1 %v104_v12 }
  0x24   :  { %128 = vmatpush.msra.mxu1 %v103_v13 }
  0x26   :  { %129 = vmatpush.msra.mxu1 %v102_v14 }
  0x28   :  { %130 = vmatpush.msra.mxu1 %v101_v15 }
  0x2a   :  { %131 = vmatpush.msra.mxu1 %v100_v16 }
  0x2c   :  { %132 = vmatpush.msra.mxu1 %v99_v17 }
  0x2e   :  { %133 = vmatpush.msra.mxu1 %v98_v18 }
  0x8f   :  { %v94_v20 = vpop.f32.mrf.mxu0 }
  0x90   :  { %v95_v21 = vadd.f32 %v164_v19, %v94_v20 }
  0x92   :  { %v97_v22 = vmax.f32 %v95_v21, 0.0 }
  0x94   :  { %134 = vmatmul.f32.vlgmr.msra.gmra.mxu1 %v97_v22 }
 0x111   :  { %v135_v24 = vpop.f32.mrf.mxu1 }
 0x112   :  { %v136_v25 = vadd.f32 %v165_v23, %v135_v24 }
 0x114   :  { %138 = vst [vmem:[#allocation8] sm:$0xff] %v136_v25 }
 0x115   :  { %149 = dma.vmem_to_hbm [thread:$0]  %s145_s12, 128, %s147_s15, [#allocation4]  }
 0x116   :  { %266 = dma.done.wait [#allocation4], 128  }
 0x117   :  { %267 = vsyncadd [#allocation4], 4294967168 }
 0x118   :  { %154 = vsyncpa [#allocation3], 1 }
 0x119   :  { %155 = vsyncpa [#allocation6], 1 }
 0x11a   :  { %156 = vsyncpa [#allocation4], 1 }

// kernel: tpu_custom_call.1
= control target key start
LH: loop header
LB: loop body
LE: loop exit
PB: predicated region body
PF: predicated region fallthrough
CT: control target
= control target key end

     0   :  { %10 = vsyncpa [#allocation3], 0  ;;  %s322_s0 = inlined_call_operand.hbm [shape: f32[8,16], index: 0, kind: input, shape index: {}]   ;;  %s323_s1 = inlined_call_operand.hbm [shape: f32[16,128], index: 1, kind: input, shape index: {}]   ;;  %s324_s2 = inlined_call_operand.vmem [shape: f32[1,128], index: 2, kind: input, shape index: {}]   ;;  %s325_s3 = inlined_call_operand.hbm [shape: f32[128,128], index: 3, kind: input, shape index: {}]   ;;  %s326_s4 = inlined_call_operand.vmem [shape: f32[1,128], index: 4, kind: input, shape index: {}]   ;;  %s327_s5 = inlined_call_operand.hbm [shape: f32[8,128], index: 5, kind: output, shape index: {}]  }
   0x1   :  { %11 = vsyncpa [#allocation6], 0  ;;  %s28_s20 = sshll.u32 %s323_s1, 4  ;;  %s29_s20 = int_to_ptr.hbm [resolvable:$true] %s28_s20 }
   0x2   :  { %12 = vsyncpa [#allocation4], 0  ;;  %s268_s21 = smov [#allocation5]   ;;  %s18_s25 = sshll.u32 %s322_s0, 4  ;;  %s19_s25 = int_to_ptr.hbm [resolvable:$true] %s18_s25 }
   0x3   :  { %s30_s22 = sshll.u32 %s268_s21, 4  ;;  %s269_s26 = smov 128   ;;  %s31_s22 = int_to_ptr.vmem [resolvable:$true] %s30_s22 }
   0x4   :  { %s270_s27 = smov 8   ;;  %s271_s28 = smov [#allocation2]  }
   0x5   :  { %36 = dma.hbm_to_vmem [thread:$0]  %s29_s20, 256, %s31_s22, [#allocation6], %s269_s26, %s269_s26, %s270_s27  }
   0x6   :  { %s20_s29 = sshll.u32 %s271_s28, 4  ;;  %s43_s7 = sshll.u32 %s325_s3, 4  ;;  %s21_s29 = int_to_ptr.vmem [resolvable:$true] %s20_s29  ;;  %s44_s7 = int_to_ptr.hbm [resolvable:$true] %s43_s7 }
   0x7   :  { %23 = dma.hbm_to_vmem [thread:$0]  %s19_s25, 128, %s21_s29, [#allocation3]  }
   0x8   :  { %s272_s1 = smov [#allocation7]  }
   0x9   :  { %s45_s8 = sshll.u32 %s272_s1, 4  ;;  %s46_s8 = int_to_ptr.vmem [resolvable:$true] %s45_s8 }
   0xa   :  { %51 = dma.hbm_to_vmem [thread:$0]  %s44_s7, 2048, %s46_s8, [#allocation6], %s269_s26, %s269_s26, %s270_s27  }
   0xb   :  { %262 = dma.done.wait [#allocation3], 128  }
   0xc   :  { %263 = vsyncadd [#allocation3], 4294967168 }
   0xd   :  { %264 = dma.done.wait [#allocation6], 2304  }
   0xe   :  { %265 = vsyncadd [#allocation6], 4294964992  ;;  %v68_v0 = vld [vmem:[#allocation5 + $0x8] sm:$0xff]  ;;  %v67_v1 = vld [vmem:[#allocation5] sm:$0xff]  ;;  %vm73_vm0 = vcmask 130048   ;;  %s273_s11 = smov [#allocation8]  }
   0xf   :  { %91 = vmatpush.msra.mxu0 %v68_v0  ;;  %v66_v2 = vld [vmem:[#allocation2] sm:$0xff]  ;;  %v113_v3 = vld [vmem:[#allocation7 + $0x78] sm:$0xff]  ;;  %v112_v4 = vld [vmem:[#allocation7 + $0x70] sm:$0xff]  ;;  %s144_s12 = sshll.u32 %s273_s11, 4  ;;  %s146_s15 = sshll.u32 %s327_s5, 4  ;;  %s145_s12 = int_to_ptr.vmem [resolvable:$true] %s144_s12  ;;  %s147_s15 = int_to_ptr.hbm [resolvable:$true] %s146_s15 }
  0x10   :  { %118 = vmatpush.msra.mxu1 %v113_v3  ;;  %v111_v5 = vld [vmem:[#allocation7 + $0x68] sm:$0xff]  ;;  %v110_v6 = vld [vmem:[#allocation7 + $0x60] sm:$0xff]  ;;  %v109_v7 = vld [vmem:[#allocation7 + $0x58] sm:$0xff] }
  0x11   :  { %92 = vmatpush.msra.mxu0 %v67_v1  ;;  %v108_v8 = vld [vmem:[#allocation7 + $0x50] sm:$0xff]  ;;  %v107_v9 = vld [vmem:[#allocation7 + $0x48] sm:$0xff]  ;;  %v106_v10 = vld [vmem:[#allocation7 + $0x40] sm:$0xff] }
  0x12   :  { %157 = vmatmul.msk.f32.vlgmr.msra.gmra.mxu0 %vm73_vm0, %v66_v2  ;;  %119 = vmatpush.msra.mxu1 %v112_v4  ;;  %v105_v11 = vld [vmem:[#allocation7 + $0x38] sm:$0xff]  ;;  %v104_v12 = vld [vmem:[#allocation7 + $0x30] sm:$0xff]  ;;  %v103_v13 = vld [vmem:[#allocation7 + $0x28] sm:$0xff] }
  0x13   :  { %v102_v14 = vld [vmem:[#allocation7 + $0x20] sm:$0xff]  ;;  %v101_v15 = vld [vmem:[#allocation7 + $0x18] sm:$0xff]  ;;  %v100_v16 = vld [vmem:[#allocation7 + $0x10] sm:$0xff] }
  0x14   :  { %120 = vmatpush.msra.mxu1 %v111_v5  ;;  %v99_v17 = vld [vmem:[#allocation7 + $0x8] sm:$0xff]  ;;  %v98_v18 = vld [vmem:[#allocation7] sm:$0xff] }
  0x15   :  { %v164_v19 = vld [vmem:[%s324_s2] ss:$0 sm:$0xff] }
  0x16   :  { %121 = vmatpush.msra.mxu1 %v110_v6  ;;  %v165_v23 = vld [vmem:[%s326_s4] ss:$0 sm:$0xff] }
  0x18   :  { %122 = vmatpush.msra.mxu1 %v109_v7 }
  0x1a   :  { %123 = vmatpush.msra.mxu1 %v108_v8 }
  0x1c   :  { %124 = vmatpush.msra.mxu1 %v107_v9 }
  0x1e   :  { %125 = vmatpush.msra.mxu1 %v106_v10 }
  0x20   :  { %126 = vmatpush.msra.mxu1 %v105_v11 }
  0x22   :  { %127 = vmatpush.msra.mxu1 %v104_v12 }
  0x24   :  { %128 = vmatpush.msra.mxu1 %v103_v13 }
  0x26   :  { %129 = vmatpush.msra.mxu1 %v102_v14 }
  0x28   :  { %130 = vmatpush.msra.mxu1 %v101_v15 }
  0x2a   :  { %131 = vmatpush.msra.mxu1 %v100_v16 }
  0x2c   :  { %132 = vmatpush.msra.mxu1 %v99_v17 }
  0x2e   :  { %133 = vmatpush.msra.mxu1 %v98_v18 }
  0x8f   :  { %v94_v20 = vpop.f32.mrf.mxu0 }
  0x90   :  { %v95_v21 = vadd.f32 %v164_v19, %v94_v20 }
  0x92   :  { %v97_v22 = vmax.f32 %v95_v21, 0.0 }
  0x94   :  { %134 = vmatmul.f32.vlgmr.msra.gmra.mxu1 %v97_v22 }
 0x111   :  { %v135_v24 = vpop.f32.mrf.mxu1 }
 0x112   :  { %v136_v25 = vadd.f32 %v165_v23, %v135_v24 }
 0x114   :  { %138 = vst [vmem:[#allocation8] sm:$0xff] %v136_v25 }
 0x115   :  { %149 = dma.vmem_to_hbm [thread:$0]  %s145_s12, 128, %s147_s15, [#allocation4]  }
 0x116   :  { %266 = dma.done.wait [#allocation4], 128  }
 0x117   :  { %267 = vsyncadd [#allocation4], 4294967168 }
 0x118   :  { %154 = vsyncpa [#allocation3], 1 }
 0x119   :  { %155 = vsyncpa [#allocation6], 1 }
 0x11a   :  { %156 = vsyncpa [#allocation4], 1 }

</bundles_post_ra>
